<compile_context>
chip_gen: v7x
topology: tpu7x:2x2x1
jax: 0.10.0
libtpu: 0.0.40
codegen_flags: <defaults>
</compile_context>

<pallas_src>
import math

import jax
import jax.numpy as jnp
from jax.experimental import pallas as pl
from jax.experimental.pallas import tpu as pltpu


_SQRT_2_OVER_PI = math.sqrt(2.0 / math.pi)


def _gelu_new(x):
    # HF "gelu_new" (tanh approximation) — the activation T5 v1.1 gated FFN uses.
    # tanh goes to the EUP slot; reuse x*x to keep VALU work minimal.
    x2 = x * x
    return 0.5 * x * (1.0 + jnp.tanh(_SQRT_2_OVER_PI * x * (1.0 + 0.044715 * x2)))


# ---------------------------- pallas kernel ----------------------------
def t5_gated_ffn_kernel(x_ref, wi_ref, wo_ref, out_ref, acc_ref):
    # x_ref:   (bm, D)      bf16 rows of the flattened (B*S, D) hidden states
    # wi_ref:  (D, 2*bf)    bf16 [Wi0 tile | Wi1 tile] for this F chunk
    # wo_ref:  (bf, D)      bf16 Wo tile for this F chunk
    # out_ref: (bm, D)      written only on the last F step
    # acc_ref: (bm, D) f32  running sum over F chunks
    k = pl.program_id(1)

    @pl.when(k == 0)
    def _init():
        acc_ref[...] = jnp.zeros_like(acc_ref)

    bf = wo_ref.shape[0]
    x = x_ref[...]                                                        # bf16 (bm, D)
    # Single MXU pass produces both the gate and linear halves for this F chunk.
    both = jnp.dot(x, wi_ref[...], preferred_element_type=jnp.float32)    # (bm, 2*bf) f32
    gate = both[:, :bf]
    lin = both[:, bf:]
    h = _gelu_new(gate) * lin                                             # f32 on VPU/EUP

    # TODO(synk): dropout between the gated product and wo is identity (eval mode).
    acc_ref[...] += jnp.dot(h.astype(jnp.bfloat16), wo_ref[...],
                            preferred_element_type=jnp.float32)           # (bm, D)

    @pl.when(k == pl.num_programs(1) - 1)
    def _finalize():
        out_ref[...] = acc_ref[...].astype(out_ref.dtype)


# ------------------------------ wrapper ------------------------------
def _round_up(x, m):
    return ((x + m - 1) // m) * m


def _pick_block_f(F, cap=2048):
    for bf in (2048, 1024, 512, 256, 128):
        if bf <= cap and F % bf == 0:
            return bf
    return F  # small / irregular d_ff: take it whole


def _vmem_bytes(block_m, block_f, D, out_itemsize):
    bf16 = 2
    x_tile = block_m * D * bf16 * 2               # double-buffered input
    wi_tile = D * 2 * block_f * bf16 * 2
    wo_tile = block_f * D * bf16 * 2
    out_tile = block_m * D * out_itemsize * 2
    acc = block_m * D * 4                         # f32 scratch accumulator
    live_h = block_m * 2 * block_f * 4            # (bm, 2*bf) f32 intermediate
    return x_tile + wi_tile + wo_tile + out_tile + acc + live_h


def t5_dense_gated_act_dense(hidden_states, wi0, wi1, wo, *,
                             block_m=None, block_f=None,
                             vmem_budget_bytes=48 * 1024 * 1024):
    """hidden_states: (B, S, D); wi0/wi1: (D, F); wo: (F, D) — pre-transposed."""
    B, S, D = hidden_states.shape
    F = wi0.shape[1]
    out_dtype = hidden_states.dtype
    M = B * S

    # ---- tile sizing -------------------------------------------------------
    if block_m is None:
        # >= 2 M-steps so the "parallel" row axis shards across both v7x TCs;
        # cap at 256 rows to bound the (bm, 2*bf) f32 intermediate (v5e spill).
        block_m = min(256, max(8, _round_up(pl.cdiv(M, 2), 8)))
    if block_f is None:
        block_f = _pick_block_f(F)
    itemsize = jnp.dtype(out_dtype).itemsize
    # Shrink the F tile, then the row tile, until we fit the VMEM budget.
    while (_vmem_bytes(block_m, block_f, D, itemsize) > vmem_budget_bytes
           and block_f > 128 and F % (block_f // 2) == 0):
        block_f //= 2
    while _vmem_bytes(block_m, block_f, D, itemsize) > vmem_budget_bytes and block_m > 8:
        block_m = max(8, _round_up(block_m // 2, 8))
    assert F % block_f == 0, "d_ff must be divisible by the chosen F tile"

    # ---- operand prep (bf16 MXU operands, f32 accumulation) ----------------
    x2d = hidden_states.reshape(M, D).astype(jnp.bfloat16)
    Mp = _round_up(M, block_m)
    if Mp != M:                       # ragged B*S: zero-pad rows, slice after
        x2d = jnp.pad(x2d, ((0, Mp - M), (0, 0)))

    nF = F // block_f
    # Interleave Wi0 / Wi1 per F-tile so each grid step reads one contiguous
    # (D, 2*block_f) slab: [Wi0 tile k | Wi1 tile k].
    wi_cat = jnp.concatenate(
        [wi0.reshape(D, nF, 1, block_f), wi1.reshape(D, nF, 1, block_f)],
        axis=2).reshape(D, 2 * F).astype(jnp.bfloat16)
    wo_b = wo.astype(jnp.bfloat16)

    grid = (Mp // block_m, nF)

    out2d = pl.pallas_call(
        t5_gated_ffn_kernel,
        out_shape=jax.ShapeDtypeStruct((Mp, D), out_dtype),
        grid_spec=pltpu.PrefetchScalarGridSpec(
            num_scalar_prefetch=0,
            grid=grid,
            in_specs=[
                pl.BlockSpec((block_m, D), lambda i, k: (i, 0)),        # x rows
                pl.BlockSpec((D, 2 * block_f), lambda i, k: (0, k)),    # [Wi0|Wi1] F tile
                pl.BlockSpec((block_f, D), lambda i, k: (k, 0)),        # Wo F tile
            ],
            out_specs=pl.BlockSpec((block_m, D), lambda i, k: (i, 0)),
            scratch_shapes=[pltpu.VMEM((block_m, D), jnp.float32)],
        ),
        compiler_params=pltpu.CompilerParams(
            dimension_semantics=("parallel", "arbitrary"),
            vmem_limit_bytes=vmem_budget_bytes,
        ),
    )(x2d, wi_cat, wo_b)

    return out2d[:M].reshape(B, S, D)


# --------------------------- pure-JAX reference ---------------------------
def reference(hidden_states, wi0, wi1, wo):
    # Mirrors the kernel's bf16 operand rounding (with f32 math) so the
    # comparison isolates tiling / accumulation-order error.
    x = hidden_states.astype(jnp.bfloat16).astype(jnp.float32)
    w0 = wi0.astype(jnp.bfloat16).astype(jnp.float32)
    w1 = wi1.astype(jnp.bfloat16).astype(jnp.float32)
    wob = wo.astype(jnp.bfloat16).astype(jnp.float32)
    gate = _gelu_new(x @ w0)
    lin = x @ w1
    h = (gate * lin).astype(jnp.bfloat16).astype(jnp.float32)
    return h @ wob


# --------------------------------- main ---------------------------------
if __name__ == "__main__":
    # Small but lane-dense shapes: D=128 -> unmasked output stores; M=128 ->
    # two row tiles (both v7x TCs busy); F=512 with block_f=256 -> two
    # F-accumulation steps exercising the pl.when init/finalize path.
    B, S, D_MODEL, D_FF = 2, 64, 128, 512

    key = jax.random.PRNGKey(0)
    k_x, k_0, k_1, k_o = jax.random.split(key, 4)

    hidden_states = jax.random.normal(k_x, (B, S, D_MODEL), jnp.float32)
    # T5-style small init; weights stored as (in_features, out_features).
    wi0 = 0.05 * jax.random.normal(k_0, (D_MODEL, D_FF), jnp.float32)
    wi1 = 0.05 * jax.random.normal(k_1, (D_MODEL, D_FF), jnp.float32)
    wo = 0.05 * jax.random.normal(k_o, (D_FF, D_MODEL), jnp.float32)

    out = t5_dense_gated_act_dense(hidden_states, wi0, wi1, wo, block_f=256)
    out = jax.block_until_ready(out)

    ref = reference(hidden_states, wi0, wi1, wo)
    assert out.shape == (B, S, D_MODEL)
    max_err = float(jnp.max(jnp.abs(out - ref)))
    assert jnp.allclose(out, ref, atol=1e-2, rtol=1e-2), f"mismatch vs reference: {max_err}"

    print("KERNEL_OK")
</pallas_src>

<mosaic_0001>
module attributes {stable_mosaic.version = 11 : i64} {
  func.func @t5_gated_ffn_kernel(%arg0: i32, %arg1: i32, %arg2: memref<64x128xbf16, #tpu.memory_space<vmem>>, %arg3: memref<128x512xbf16, #tpu.memory_space<vmem>>, %arg4: memref<256x128xbf16, #tpu.memory_space<vmem>>, %arg5: memref<64x128xf32, #tpu.memory_space<vmem>>, %arg6: memref<64x128xf32, #tpu.memory_space<vmem>>) attributes {dimension_semantics = [#tpu.dimension_semantics<parallel>, #tpu.dimension_semantics<arbitrary>], iteration_bounds = array<i64: 2, 2>, scalar_prefetch = 0 : i64, scratch_operands = 1 : i64, tpu.core_type = #tpu.core_type<tc>, window_params = [{transform_indices = @transform_0, window_bounds = array<i64: 64, 128>}, {transform_indices = @transform_1, window_bounds = array<i64: 128, 512>}, {transform_indices = @transform_2, window_bounds = array<i64: 256, 128>}, {transform_indices = @transform_3, window_bounds = array<i64: 64, 128>}]} {
    %c0_i32 = arith.constant 0 : i32
    %0 = arith.cmpi eq, %arg1, %c0_i32 : i32
    %1 = arith.extui %0 : i1 to i32
    %c0_i32_0 = arith.constant 0 : i32
    %2 = arith.cmpi ne, %1, %c0_i32_0 : i32
    scf.if %2 {
      %cst_17 = arith.constant 0.000000e+00 : f32
      %32 = vector.broadcast %cst_17 : f32 to vector<64x128xf32>
      %c0_18 = arith.constant 0 : index
      %c0_19 = arith.constant 0 : index
      %33 = vector.load %arg6[%c0_18, %c0_19] : memref<64x128xf32, #tpu.memory_space<vmem>>, vector<64x128xf32>
      tpu.vector_store %arg6[%c0_18, %c0_19], %32 {strides = array<i32>} : memref<64x128xf32, #tpu.memory_space<vmem>>, vector<64x128xf32>,
    } else {
    }
    %c0 = arith.constant 0 : index
    %c0_1 = arith.constant 0 : index
    %3 = vector.load %arg2[%c0, %c0_1] : memref<64x128xbf16, #tpu.memory_space<vmem>>, vector<64x128xbf16>
    %c0_2 = arith.constant 0 : index
    %c0_3 = arith.constant 0 : index
    %4 = vector.load %arg3[%c0_2, %c0_3] : memref<128x512xbf16, #tpu.memory_space<vmem>>, vector<128x512xbf16>
    %cst = arith.constant dense<0.000000e+00> : vector<64x512xf32>
    %5 = tpu.matmul %3, %4, %cst {dimension_numbers = #tpu.dot_dimension_numbers<[1], [0], [0], [1], [0, 0, 1, 1], [], []>} : vector<64x128xbf16>, vector<128x512xbf16>, vector<64x512xf32> -> vector<64x512xf32>
    %6 = vector.extract_strided_slice %5 {offsets = [0, 0], sizes = [64, 256], strides = [1, 1]} : vector<64x512xf32> to vector<64x256xf32>
    %7 = vector.extract_strided_slice %5 {offsets = [0, 256], sizes = [64, 256], strides = [1, 1]} : vector<64x512xf32> to vector<64x256xf32>
    %8 = arith.mulf %6, %6 : vector<64x256xf32>
    %cst_4 = arith.constant 5.000000e-01 : f32
    %9 = vector.broadcast %cst_4 : f32 to vector<64x256xf32>
    %10 = arith.mulf %9, %6 : vector<64x256xf32>
    %cst_5 = arith.constant 0.797884583 : f32
    %11 = vector.broadcast %cst_5 : f32 to vector<64x256xf32>
    %12 = arith.mulf %11, %6 : vector<64x256xf32>
    %cst_6 = arith.constant 4.471500e-02 : f32
    %13 = vector.broadcast %cst_6 : f32 to vector<64x256xf32>
    %14 = arith.mulf %13, %8 : vector<64x256xf32>
    %cst_7 = arith.constant 1.000000e+00 : f32
    %15 = vector.broadcast %cst_7 : f32 to vector<64x256xf32>
    %16 = arith.addf %15, %14 : vector<64x256xf32>
    %17 = arith.mulf %12, %16 : vector<64x256xf32>
    %18 = math.tanh %17 : vector<64x256xf32>
    %cst_8 = arith.constant 1.000000e+00 : f32
    %19 = vector.broadcast %cst_8 : f32 to vector<64x256xf32>
    %20 = arith.addf %19, %18 : vector<64x256xf32>
    %21 = arith.mulf %10, %20 : vector<64x256xf32>
    %22 = arith.mulf %21, %7 : vector<64x256xf32>
    %c0_9 = arith.constant 0 : index
    %c0_10 = arith.constant 0 : index
    %23 = vector.load %arg6[%c0_9, %c0_10] : memref<64x128xf32, #tpu.memory_space<vmem>>, vector<64x128xf32>
    %24 = arith.truncf %22 : vector<64x256xf32> to vector<64x256xbf16>
    %c0_11 = arith.constant 0 : index
    %c0_12 = arith.constant 0 : index
    %25 = vector.load %arg4[%c0_11, %c0_12] : memref<256x128xbf16, #tpu.memory_space<vmem>>, vector<256x128xbf16>
    %cst_13 = arith.constant dense<0.000000e+00> : vector<64x128xf32>
    %26 = tpu.matmul %24, %25, %cst_13 {dimension_numbers = #tpu.dot_dimension_numbers<[1], [0], [0], [1], [0, 0, 1, 1], [], []>} : vector<64x256xbf16>, vector<256x128xbf16>, vector<64x128xf32> -> vector<64x128xf32>
    %27 = arith.addf %23, %26 : vector<64x128xf32>
    %c0_14 = arith.constant 0 : index
    %c0_15 = arith.constant 0 : index
    %28 = vector.load %arg6[%c0_14, %c0_15] : memref<64x128xf32, #tpu.memory_space<vmem>>, vector<64x128xf32>
    tpu.vector_store %arg6[%c0_14, %c0_15], %27 {strides = array<i32>} : memref<64x128xf32, #tpu.memory_space<vmem>>, vector<64x128xf32>,
    %c1_i32 = arith.constant 1 : i32
    %29 = arith.cmpi eq, %arg1, %c1_i32 : i32
    %30 = arith.extui %29 : i1 to i32
    %c0_i32_16 = arith.constant 0 : i32
    %31 = arith.cmpi ne, %30, %c0_i32_16 : i32
    scf.if %31 {
      %c0_17 = arith.constant 0 : index
      %c0_18 = arith.constant 0 : index
      %32 = vector.load %arg6[%c0_17, %c0_18] : memref<64x128xf32, #tpu.memory_space<vmem>>, vector<64x128xf32>
      %c0_19 = arith.constant 0 : index
      %c0_20 = arith.constant 0 : index
      %33 = vector.load %arg5[%c0_19, %c0_20] : memref<64x128xf32, #tpu.memory_space<vmem>>, vector<64x128xf32>
      tpu.vector_store %arg5[%c0_19, %c0_20], %32 {strides = array<i32>} : memref<64x128xf32, #tpu.memory_space<vmem>>, vector<64x128xf32>,
    } else {
    }
    return
  }
  func.func @transform_0(%arg0: i32, %arg1: i32) -> (i32, i32) {
    %c0_i32 = arith.constant 0 : i32
    %c0_i32_0 = arith.constant 0 : i32
    return %arg0, %c0_i32 : i32, i32
  }
  func.func @transform_1(%arg0: i32, %arg1: i32) -> (i32, i32) {
    %c0_i32 = arith.constant 0 : i32
    %c0_i32_0 = arith.constant 0 : i32
    return %c0_i32, %arg1 : i32, i32
  }
  func.func @transform_2(%arg0: i32, %arg1: i32) -> (i32, i32) {
    %c0_i32 = arith.constant 0 : i32
    %c0_i32_0 = arith.constant 0 : i32
    return %arg1, %c0_i32 : i32, i32
  }
  func.func @transform_3(%arg0: i32, %arg1: i32) -> (i32, i32) {
    %c0_i32 = arith.constant 0 : i32
    %c0_i32_0 = arith.constant 0 : i32
    return %arg0, %c0_i32 : i32, i32
  }
}

</mosaic_0001>

<bundles_post_ra>
// kernel: tpu_custom_call.1
= control target key start
LH: loop header
LB: loop body
LE: loop exit
PB: predicated region body
PF: predicated region fallthrough
CT: control target
= control target key end

     0   :  { %s2358_s0 = inlined_call_operand.hbm [shape: bf16[128,128], index: 0, kind: input, shape index: {}]   ;;  %s2359_s1 = inlined_call_operand.hbm [shape: bf16[128,1024], index: 1, kind: input, shape index: {}]   ;;  %s2360_s2 = inlined_call_operand.hbm [shape: bf16[512,128], index: 2, kind: input, shape index: {}]   ;;  %s2361_s3 = inlined_call_operand.hbm [shape: f32[128,128], index: 3, kind: output, shape index: {}]  }
   0x1   :  { %2374 = sst [smem:[#allocation19_spill]] %s2358_s0 }
   0x2   :  { %2375 = sst [smem:[#allocation20_spill]] %s2359_s1 }
   0x3   :  { %2376 = sst [smem:[#allocation21_spill]] %s2361_s3 }
   0x4   :  { %8 = vsyncpa [#allocation4], 0 }
   0x5   :  { %10 = vsyncpa [#allocation4 + $0x1], 0 }
   0x6   :  { %11 = vsyncpa [#allocation7], 0 }
   0x7   :  { %13 = vsyncpa [#allocation7 + $0x1], 0 }
   0x8   :  { %14 = vsyncpa [#allocation5], 0 }
   0x9   :  { %16 = vsyncpa [#allocation5 + $0x1], 0  ;;  %s1820_s12 = smov 0   ;;  %s1822_s13 = smov 0  }
   0xa   :  { %s1824_s14 = smov 0   ;;  %s1826_s15 = smov 0  }
   0xb   :  { %s1828_s16 = smov 0   ;;  %s1830_s17 = smov 0  }
   0xc   :  { %s1832_s18 = smov 0   ;;  %s1834_s19 = smov 0  }
   0xd   :  { %s1836_s20 = smov 0   ;;  %s1838_s21 = smov 0  }
   0xe   :  { %s1840_s22 = smov 0  }
   0xf LB: > { %2377 = sst [smem:[#allocation13_spill]] %s1765_s17  ;;  %s31_s23 = sadd.s32 1, %s1777_s20  ;;  %s1785_s22 = sphi %s1840_s22, %s22_s22   ;;  %s1781_s21 = sphi %s1838_s21, %s2413_s21   ;;  %s1777_s20 = sphi %s1836_s20, %s2420_s20   ;;  %s1773_s19 = sphi %s1834_s19, %s2411_s19   ;;  %s1769_s18 = sphi %s1832_s18, %s2419_s18   ;;  %s1765_s17 = sphi %s1830_s17, %s2410_s17   ;;  %s1761_s16 = sphi %s1828_s16, %s2418_s16   ;;  %s1757_s15 = sphi %s1826_s15, %s2417_s15   ;;  %s1753_s14 = sphi %s1824_s14, %s2416_s14   ;;  %s1749_s13 = sphi %s1822_s13, %s2415_s13   ;;  %s1745_s12 = sphi %s1820_s12, %s2414_s12  }
  0x10   : > { %2378 = sst [smem:[#allocation14_spill]] %s1781_s21  ;;  %p2363_p0 = scmp.eq.s32.totalorder %s1785_s22, 0 }
  0x11   : > { %p1877_p1 = scmp.ge.s32.totalorder %s31_s23, 2  ;;  %s67_s25 = sadd.s32 1, %s1753_s14 }
  0x12   : > { %p74_p2 = scmp.ne.s32.totalorder %s1753_s14, %s1749_s13  ;;  %p2362_p5 = scmp.lt.s32.totalorder %s1785_s22, 4 }
  0x13   : > { %s2422_s23 = smov (%p1877_p1, %s31_s23), 0  ;;  %s177_s27 = sand.u32 1, %s1785_s22  }
  0x14   : > { %2380 = sst [smem:[#allocation15_spill]] %s2422_s23  ;;  %p76_p4 = por %p74_p2, %p2363_p0 }
  0x15   : > { %s64_s26 = ssub.s32 %s1777_s20, %s2422_s23  ;;  %s2364_s28 = sand.u32 1, %s1753_s14  }
  0x16   : > { %p65_p6 = scmp.eq.s32.totalorder %s64_s26, 0  ;;  %s1218_s30 = sshll.u32 %s2364_s28, 8 }
  0x17   : > { %s1289_s4 = sshll.u32 %s1777_s20, 8  ;;  %s2382_s1 = sld [smem:[#allocation20_spill]] }
  0x18   : > { %s1898_s29 = scalar_select %p65_p6, %s1753_s14, %s67_s25  }
  0x19   : > { %s181_s8 = scalar_lea.vmem [#allocation6], %s1218_s30  ;;  %p1910_p7 = pnand %p2362_p5, %p76_p4 }
  0x1a   : > { %2381 = sst [smem:[#allocation16_spill]] %s1898_s29  ;;  %s188_s9 = sshll.u32 %s181_s8, 4  ;;  %s1914_s9 = int_to_ptr.vmem [resolvable:$true] %s188_s9 }
  0x1b   : > { %s1917_s11 = scalar_lea.sflag [#allocation7], %s177_s27  ;;  %p2365_p10 = pneg %p1910_p7 }
  0x1d   : > { %s1906_s7 = scalar_lea.hbm %s2382_s1, %s1289_s4  ;;  %s1574_s4 = scalar_lea.hbm %s2382_s1, 8192 }
  0x1e   : > { %s1569_s25 = scalar_lea.hbm %s1906_s7, 4096  ;;  %p1575_p13 = scmp.lt.u32.totalorder %s1906_s7, %s2382_s1 }
  0x1f   : > { %p1570_p9 = scmp.ne.s32.totalorder %s1906_s7, %s1569_s25  ;;  %p1576_p2 = scmp.lt.u32.totalorder %s1574_s4, %s1569_s25 }
  0x20   : > { %p1578_p6 = scmp.lt.u32.totalorder %s1569_s25, %s1906_s7 }
  0x21   : > { %p1572_p11 = pnand %p2365_p10, %p1570_p9  ;;  %p1577_p4 = por %p1576_p2, %p1575_p13 }
  0x23   : > { %p1573_p12 = pneg %p1572_p11  ;;  %p1579_p5 = por %p1578_p6, %p1577_p4 }
  0x25   : > { %p1580_p3 = pnand %p1579_p5, %p1573_p12 }
  0x27   : > { %1583 = shalt.err (!%p1580_p3)
}
  0x28   : > { %s1584_s27 = scalar_lea.vmem %s1914_s9, 4096  ;;  %s1787_s8 = smov [#allocation6]  }
  0x29   : > { %p1585_p9 = scmp.ne.s32.totalorder %s1914_s9, %s1584_s27  ;;  %s1589_s26 = sshll.u32 %s1787_s8, 4  ;;  %s1590_s26 = int_to_ptr.vmem [resolvable:$false] %s1589_s26 }
  0x2a   : > { %s1591_s30 = scalar_lea.vmem %s1590_s26, 8192  ;;  %p1592_p8 = scmp.lt.s32.totalorder %s1914_s9, %s1590_s26 }
  0x2b   : > { %p1587_p11 = pnand %p1585_p9, %p2365_p10  ;;  %p1593_p13 = scmp.lt.s32.totalorder %s1591_s30, %s1584_s27 }
  0x2d   : > { %p1588_p0 = pneg %p1587_p11  ;;  %p1594_p2 = por %p1593_p13, %p1592_p8 }
  0x2f   : > { %p1595_p4 = pnand %p1594_p2, %p1588_p0 }
  0x31   : > { %1598 = shalt.err (!%p1595_p4)
}
  0x32   : > { %s1788_s25 = smov 512   ;;  %s1789_s4 = smov 256  }
  0x33   : > { %s1790_s5 = smov 16   ;;  %p217_p0 = scmp.lt.s32.totalorder %s1785_s22, 5 }
  0x34   : > { %1362 = dma.hbm_to_vmem [thread:$0]  (!%p1910_p7), %s1906_s7, 4096, %s1914_s9, %s1917_s11, %s1788_s25, %s1789_s4, %s1790_s5  }
  0x35   : > { %p2384_p3 = scmp.ge.s32.totalorder %s1785_s22, 1  ;;  %s1953_s27 = sadd.s32 4294967295, %s1785_s22  }
  0x36   : > { %s1212_s8 = sadd.s32 4294967294, %s1785_s22   ;;  %s34_s26 = sadd.s32 1, %s1781_s21 }
  0x37   : > { %p1948_p5 = pnand %p2384_p3, %p217_p0  ;;  %s41_s30 = sadd.s32 1, %s1765_s17 }
  0x38   : > { %s2424_s26 = smov (!%p1877_p1, %s34_s26), %s1781_s21  ;;  %p48_p8 = scmp.ne.s32.totalorder %s1765_s17, %s1761_s16 }
  0x39   : > { %s2385_s6 = scalar_select %p1948_p5, 1, 0 }
  0x3a   : > { %p54_p12 = scmp.ne.s32.totalorder %s1761_s16, %s1757_s15  ;;  %p36_p6 = scmp.ge.s32.totalorder %s2424_s26, 2 }
  0x3b   : > { %p55_p9 = scmp.eq.s32.totalorder %s1953_s27, 0  ;;  %p2386_p11 = scmp.eq.s32.totalorder %s1785_s22, 0 }
  0x3c   : > { %p130_p2 = scmp.eq.s32.totalorder %s1953_s27, 3  ;;  %s2426_s26 = smov (%p36_p6, %s2424_s26), 0 }
  0x3d   : > { %p1968_p13 = por %p2386_p11, %p48_p8  ;;  %2388 = sst [smem:[#allocation17_spill]] %s2426_s26 }
  0x3e   : > { %p1978_p1 = por %p55_p9, %p54_p12  ;;  %p2390_p4 = scmp.ne.s32.totalorder %s1749_s13, %s1745_s12 }
  0x3f   : > { %s38_s25 = ssub.s32 %s1781_s21, %s2426_s26  ;;  %p1991_p3 = por %p130_p2, %p48_p8 }
  0x40   : > { %s2389_s24 = scalar_select %p1978_p1, 1, 0 }
  0x41   : > { %p1985_p0 = por %p2390_p4, %p55_p9  ;;  %p39_p11 = scmp.eq.s32.totalorder %s38_s25, 0 }
  0x42   : > { %s2392_s4 = scalar_select %p1991_p3, 1, 0 }
  0x43   : > { %s2391_s9 = scalar_select %p1985_p0, 1, 0 }
  0x44   : > { %p136_p6 = scmp.eq.s32.totalorder %s1212_s8, 3  ;;  %s156_s5 = sand.u32 1, %s1765_s17  }
  0x45   : > { %s1288_s28 = sshll.u32 %s1781_s21, 9  ;;  %s1215_s12 = sshll.u32 %s156_s5, 5 }
  0x46   : > { %s1998_s1 = scalar_select %p39_p11, %s1765_s17, %s41_s30  }
  0x47   : > { %p2003_p10 = por %p136_p6, %p54_p12  ;;  %s2395_s0 = sld [smem:[#allocation19_spill]] }
  0x48   : > { %2393 = sst [smem:[#allocation18_spill]] %s1998_s1  ;;  %p2396_p8 = scmp.lt.s32.totalorder %s1785_s22, 4 }
  0x49   : > { %s2394_s23 = scalar_select %p2003_p10, 1, 0 }
  0x4a   : > { %p2016_p9 = pnand %p2396_p8, %p1968_p13  ;;  %s160_s30 = scalar_lea.vmem [#allocation3], %s1215_s12 }
  0x4b   : > { %s167_s25 = sshll.u32 %s160_s30, 4  ;;  %s2398_s21 = sand.u32 1, %s1753_s14   ;;  %s2020_s25 = int_to_ptr.vmem [resolvable:$true] %s167_s25 }
  0x4c   : > { %s2024_s3 = sshll.u32 %s2398_s21, 7  ;;  %p1601_p2 = pneg %p2016_p9 }
  0x4d   : > { %s2010_s26 = scalar_lea.hbm %s2395_s0, %s1288_s28  ;;  %s2026_s28 = scalar_lea.sflag [#allocation4], %s156_s5 }
  0x4e   : > { %s1599_s29 = scalar_lea.hbm %s2010_s26, 512  ;;  %s1604_s12 = scalar_lea.hbm %s2395_s0, 1024 }
  0x4f   : > { %p1600_p12 = scmp.ne.s32.totalorder %s2010_s26, %s1599_s29  ;;  %p1605_p11 = scmp.lt.u32.totalorder %s2010_s26, %s2395_s0 }
  0x50   : > { %p1606_p6 = scmp.lt.u32.totalorder %s1604_s12, %s1599_s29  ;;  %p1608_p10 = scmp.lt.u32.totalorder %s1599_s29, %s2010_s26 }
  0x51   : > { %p1602_p13 = pnand %p1601_p2, %p1600_p12 }
  0x52   : > { %p1607_p8 = por %p1606_p6, %p1605_p11 }
  0x53   : > { %p1603_p4 = pneg %p1602_p13 }
  0x54   : > { %p1609_p3 = por %p1608_p10, %p1607_p8 }
  0x56   : > { %p1610_p0 = pnand %p1609_p3, %p1603_p4 }
  0x58   : > { %1613 = shalt.err (!%p1610_p0)
}
  0x59   : > { %s1614_s21 = scalar_lea.vmem %s2020_s25, 512  ;;  %s1791_s1 = smov [#allocation3]  }
  0x5a   : > { %p1615_p12 = scmp.ne.s32.totalorder %s2020_s25, %s1614_s21  ;;  %s1619_s5 = sshll.u32 %s1791_s1, 4  ;;  %s1620_s5 = int_to_ptr.vmem [resolvable:$false] %s1619_s5 }
  0x5b   : > { %s1621_s17 = scalar_lea.vmem %s1620_s5, 1024  ;;  %p1622_p5 = scmp.lt.s32.totalorder %s2020_s25, %s1620_s5 }
  0x5c   : > { %p1617_p13 = pnand %p1615_p12, %p1601_p2  ;;  %p1623_p11 = scmp.lt.s32.totalorder %s1621_s17, %s1614_s21 }
  0x5e   : > { %p1618_p1 = pneg %p1617_p13  ;;  %p1624_p6 = por %p1623_p11, %p1622_p5 }
  0x60   : > { %p1625_p10 = pnand %p1624_p6, %p1618_p1 }
  0x62   : > { %1628 = shalt.err (!%p1625_p10)
}
  0x63   : > { %s1792_s29 = smov 64   ;;  %s1793_s7 = smov 4  }
  0x64   : > { %1359 = dma.hbm_to_vmem [thread:$0]  (!%p2016_p9), %s2010_s26, 512, %s2020_s25, %s2026_s28, %s1792_s29, %s1792_s29, %s1793_s7  }
  0x65   : > { %s1290_s12 = sshll.u32 %s1777_s20, 11  ;;  %s202_s5 = scalar_lea.vmem [#allocation8], %s2024_s3 }
  0x66   : > { %s2061_s1 = scalar_lea.hbm %s2360_s2, %s1290_s12  ;;  %s209_s17 = sshll.u32 %s202_s5, 4  ;;  %s2064_s17 = int_to_ptr.vmem [resolvable:$true] %s209_s17 }
  0x67   : > { %s1629_s0 = scalar_lea.hbm %s2061_s1, 2048  ;;  %p2399_p1 = pneg %p1910_p7 }
  0x68   : > { %p1630_p5 = scmp.ne.s32.totalorder %s2061_s1, %s1629_s0  ;;  %s1634_s25 = scalar_lea.hbm %s2360_s2, 4096 }
  0x69   : > { %p1635_p9 = scmp.lt.u32.totalorder %s2061_s1, %s2360_s2  ;;  %p1636_p2 = scmp.lt.u32.totalorder %s1634_s25, %s1629_s0 }
  0x6a   : > { %p1632_p0 = pnand %p1630_p5, %p2399_p1  ;;  %p1638_p8 = scmp.lt.u32.totalorder %s1629_s0, %s2061_s1 }
  0x6b   : > { %p1637_p4 = por %p1636_p2, %p1635_p9 }
  0x6c   : > { %p1633_p3 = pneg %p1632_p0 }
  0x6d   : > { %p1639_p12 = por %p1638_p8, %p1637_p4 }
  0x6f   : > { %p1640_p13 = pnand %p1639_p12, %p1633_p3 }
  0x71   : > { %1643 = shalt.err (!%p1640_p13)
}
  0x72   : > { %s1644_s3 = scalar_lea.vmem %s2064_s17, 2048  ;;  %p2400_p6 = pmov %p2399_p1 }
  0x73   : > { %p1645_p11 = scmp.ne.s32.totalorder %s2064_s17, %s1644_s3  ;;  %s1794_s30 = smov [#allocation8]  }
  0x74   : > { %s1649_s21 = sshll.u32 %s1794_s30, 4  ;;  %s1650_s21 = int_to_ptr.vmem [resolvable:$false] %s1649_s21 }
  0x75   : > { %p1647_p10 = pnand %p1645_p11, %p2400_p6  ;;  %s1651_s5 = scalar_lea.vmem %s1650_s21, 4096 }
  0x76   : > { %p1652_p1 = scmp.lt.s32.totalorder %s2064_s17, %s1650_s21  ;;  %p1653_p0 = scmp.lt.s32.totalorder %s1651_s5, %s1644_s3 }
  0x77   : > { %p1648_p5 = pneg %p1647_p10 }
  0x78   : > { %p1654_p9 = por %p1653_p0, %p1652_p1 }
  0x7a   : > { %p1655_p2 = pnand %p1654_p9, %p1648_p5 }
  0x7c   : > { %1658 = shalt.err (!%p1655_p2)
}
  0x7d   : > { %1365 = dma.hbm_to_vmem [thread:$0]  (!%p1910_p7), %s2061_s1, 2048, %s2064_s17, %s1917_s11, %s1792_s29, %s1792_s29, %s1793_s7  }
  0x7e   : > { %p2401_p3 = scmp.ne.s32.totalorder %s2385_s6, 0 }
  0x7f   : > { %s2096_s0 = sand.u32 (!%p2401_p3), 1, %s1761_s16   ;;  %p2402_p4 = scmp.ne.s32.totalorder (!%p2401_p3), %s2389_s24, 0 }
  0x80   : > { %221 = sbr.rel (%p2401_p3) target bundleno = 712 (0x2c8), region = 32  ;;  %s1225_s26 = sshll.u32 (!%p2401_p3), %s2096_s0, 5 }
  0x81   : > { %s224_s8 = scalar_lea.sflag (!%p2401_p3), [#allocation4], %s2096_s0  ;;  %s2100_s25 = scalar_lea.vmem (!%p2401_p3), [#allocation3], %s1225_s26 }
  0x87   : > { %1732 = dma.done.wait (%p2402_p4), %s224_s8, 512  }
  0x88   : > { %1734 = vsyncadd (%p2402_p4), %s224_s8, 4294966784  ;;  %s232_s10 = sand.u32 1, %s1953_s27   ;;  %s234_s11 = sand.u32 1, %s1749_s13  }
  0x89   : > { %s1226_s6 = sshll.u32 %s234_s11, 8  ;;  %s233_s29 = scalar_lea.sflag [#allocation7], %s232_s10 }
  0x8a   : > { %s2108_s7 = scalar_lea.vmem [#allocation6], %s1226_s6  ;;  %p2403_p7 = scmp.ne.s32.totalorder %s2391_s9, 0 }
  0x8c   : > { %1736 = dma.done.wait (%p2403_p7), %s233_s29, 6144  }
  0x8d   : > { %1738 = vsyncadd (%p2403_p7), %s233_s29, 4294961152  ;;  %s1227_s1 = sshll.u32 %s234_s11, 7  ;;  %s1228_s17 = sshll.u32 %s2096_s0, 6 }
  0x8e   : > { %s2115_s28 = scalar_lea.vmem [#allocation8], %s1227_s1  ;;  %s2117_s24 = scalar_lea.vmem [#allocation9], %s1228_s17 }
  0x8f   : > { %p1229_p8 = scmp.ne.s32.totalorder %s1769_s18, 0 }
  0x90   : > { %v1795_v0 = vmov (!%p1229_p8), 0.0  }
  0x91   : > { %286 = sbr.rel (%p1229_p8) target bundleno = 152 (0x98), region = 48  ;;  %287 = vst [vmem:[#allocation2] sm:$0xff] (!%p1229_p8), %v1795_v0  ;;  %288 = vst [vmem:[#allocation2 + $0x8] sm:$0xff] (!%p1229_p8), %v1795_v0 }
  0x92   : > { %289 = vst [vmem:[#allocation2 + $0x10] sm:$0xff] (!%p1229_p8), %v1795_v0  ;;  %290 = vst [vmem:[#allocation2 + $0x18] sm:$0xff] (!%p1229_p8), %v1795_v0 }
  0x93   : > { %291 = vst [vmem:[#allocation2 + $0x20] sm:$0xff] (!%p1229_p8), %v1795_v0  ;;  %292 = vst [vmem:[#allocation2 + $0x28] sm:$0xff] (!%p1229_p8), %v1795_v0 }
  0x94   : > { %293 = vst [vmem:[#allocation2 + $0x30] sm:$0xff] (!%p1229_p8), %v1795_v0  ;;  %294 = vst [vmem:[#allocation2 + $0x38] sm:$0xff] (!%p1229_p8), %v1795_v0 }
  0x98 PF: > { %v1469_v1 = vld [vmem:[%s2108_s7 + $0x4] ss:$16 sps:$4 sm:$0xff]   ;;  %v1471_v2 = vld [vmem:[%s2108_s7] ss:$16 sps:$4 sm:$0xff]   ;;  %v1796_v3 = vmov 0   ;;  %v1509_v35 = vld [vmem:[%s2100_s25 + $0x8] sm:$0xff]  }
  0x99   : > { %551 = vmatprep.mubr.bf16.mxu0 %v1796_v3  ;;  %624 = vmatprep.mubr.bf16.mxu1 %v1796_v3  ;;  %v1472_v4 = vld [vmem:[%s2108_s7 + $0x24] ss:$16 sps:$4 sm:$0xff]   ;;  %v1474_v5 = vld [vmem:[%s2108_s7 + $0x20] ss:$16 sps:$4 sm:$0xff]   ;;  %v1486_v9 = vld [vmem:[%s2108_s7 + $0xc] ss:$16 sps:$4 sm:$0xff]  }
  0x9a   : > { %519 = vmatprep.subr.bf16.mxu0 %v1469_v1  ;;  %v1475_v6 = vld [vmem:[%s2108_s7 + $0x44] ss:$16 sps:$4 sm:$0xff]   ;;  %v1477_v7 = vld [vmem:[%s2108_s7 + $0x40] ss:$16 sps:$4 sm:$0xff]   ;;  %v1489_v10 = vld [vmem:[%s2108_s7 + $0x8] ss:$16 sps:$4 sm:$0xff]   ;;  %592 = vmatprep.subr.bf16.mxu1 %v1486_v9 }
  0x9b   : > { %520 = vmatpush1.bf16.msra.mxu0 %v1471_v2  ;;  %v1478_v8 = vld [vmem:[%s2108_s7 + $0x64] ss:$16 sps:$4 sm:$0xff]   ;;  %v1480_v11 = vld [vmem:[%s2108_s7 + $0x60] ss:$16 sps:$4 sm:$0xff]   ;;  %593 = vmatpush1.bf16.msra.mxu1 %v1489_v10  ;;  %v1492_v12 = vld [vmem:[%s2108_s7 + $0x2c] ss:$16 sps:$4 sm:$0xff]  }
  0x9c   : > { %521 = vmatprep.subr.bf16.mxu0 %v1472_v4  ;;  %v1495_v13 = vld [vmem:[%s2108_s7 + $0x28] ss:$16 sps:$4 sm:$0xff]   ;;  %v1481_v14 = vld [vmem:[%s2108_s7 + $0x84] ss:$16 sps:$4 sm:$0xff]   ;;  %594 = vmatprep.subr.bf16.mxu1 %v1492_v12  ;;  %v1498_v15 = vld [vmem:[%s2108_s7 + $0x4c] ss:$16 sps:$4 sm:$0xff]  }
  0x9d   : > { %v1483_v16 = vld [vmem:[%s2108_s7 + $0x80] ss:$16 sps:$4 sm:$0xff]   ;;  %v1501_v17 = vld [vmem:[%s2108_s7 + $0x48] ss:$16 sps:$4 sm:$0xff]   ;;  %v1484_v18 = vld [vmem:[%s2108_s7 + $0xa4] ss:$16 sps:$4 sm:$0xff]  }
  0x9e   : > { %v1503_v19 = vld [vmem:[%s2108_s7 + $0x6c] ss:$16 sps:$4 sm:$0xff]   ;;  %v1488_v20 = vld [vmem:[%s2108_s7 + $0xa0] ss:$16 sps:$4 sm:$0xff]   ;;  %v1505_v21 = vld [vmem:[%s2108_s7 + $0x68] ss:$16 sps:$4 sm:$0xff]  }
  0x9f   : > { %522 = vmatpush1.bf16.msra.mxu0 %v1474_v5  ;;  %595 = vmatpush1.bf16.msra.mxu1 %v1495_v13  ;;  %v1490_v22 = vld [vmem:[%s2108_s7 + $0xc4] ss:$16 sps:$4 sm:$0xff]   ;;  %v1506_v23 = vld [vmem:[%s2108_s7 + $0x8c] ss:$16 sps:$4 sm:$0xff]   ;;  %v1494_v24 = vld [vmem:[%s2108_s7 + $0xc0] ss:$16 sps:$4 sm:$0xff]  }
  0xa0   : > { %523 = vmatprep.subr.bf16.mxu0 %v1475_v6  ;;  %596 = vmatprep.subr.bf16.mxu1 %v1498_v15  ;;  %v1496_v25 = vld [vmem:[%s2108_s7 + $0xe4] ss:$16 sps:$4 sm:$0xff]   ;;  %v1508_v26 = vld [vmem:[%s2108_s7 + $0x88] ss:$16 sps:$4 sm:$0xff]   ;;  %v1510_v27 = vld [vmem:[%s2108_s7 + $0xac] ss:$16 sps:$4 sm:$0xff]  }
  0xa1   : > { %v1500_v28 = vld [vmem:[%s2108_s7 + $0xe0] ss:$16 sps:$4 sm:$0xff]   ;;  %v1512_v29 = vld [vmem:[%s2108_s7 + $0xa8] ss:$16 sps:$4 sm:$0xff]   ;;  %v1513_v30 = vld [vmem:[%s2108_s7 + $0xcc] ss:$16 sps:$4 sm:$0xff]  }
  0xa2   : > { %v1502_v31 = vld [vmem:[%s2100_s25] sm:$0xff]   ;;  %v1515_v32 = vld [vmem:[%s2108_s7 + $0xc8] ss:$16 sps:$4 sm:$0xff]   ;;  %v1517_v33 = vld [vmem:[%s2108_s7 + $0xec] ss:$16 sps:$4 sm:$0xff]   ;;  %p1282_p12 = scmp.ne.s32.totalorder %s1769_s18, 1 }
  0xa3   : > { %524 = vmatpush1.bf16.msra.mxu0 %v1477_v7  ;;  %597 = vmatpush1.bf16.msra.mxu1 %v1501_v17  ;;  %v1519_v34 = vld [vmem:[%s2108_s7 + $0xe8] ss:$16 sps:$4 sm:$0xff]   ;;  %v1516_v36 = vld [vmem:[%s2100_s25 + $0x10] sm:$0xff]   ;;  %v1521_v38 = vld [vmem:[%s2115_s28 + $0x40] sm:$0xff]  }
  0xa4   : > { %525 = vmatprep.subr.bf16.mxu0 %v1478_v8  ;;  %598 = vmatprep.subr.bf16.mxu1 %v1503_v19  ;;  %v1520_v37 = vld [vmem:[%s2100_s25 + $0x18] sm:$0xff]   ;;  %v1522_v39 = vld [vmem:[%s2115_s28] sm:$0xff]   ;;  %v1523_v40 = vld [vmem:[%s2115_s28 + $0x48] sm:$0xff]  }
  0xa5   : > { %v1524_v41 = vld [vmem:[%s2115_s28 + $0x8] sm:$0xff]   ;;  %v1525_v42 = vld [vmem:[%s2115_s28 + $0x50] sm:$0xff]   ;;  %v1527_v44 = vld [vmem:[%s2115_s28 + $0x58] sm:$0xff]  }
  0xa6   : > { %v1526_v43 = vld [vmem:[%s2115_s28 + $0x10] sm:$0xff]   ;;  %v1528_v45 = vld [vmem:[%s2115_s28 + $0x18] sm:$0xff]   ;;  %v1529_v46 = vld [vmem:[%s2115_s28 + $0x60] sm:$0xff]  }
  0xa7   : > { %526 = vmatpush1.bf16.msra.mxu0 %v1480_v11  ;;  %599 = vmatpush1.bf16.msra.mxu1 %v1505_v21  ;;  %v1530_v47 = vld [vmem:[%s2115_s28 + $0x20] sm:$0xff]   ;;  %v1531_v48 = vld [vmem:[%s2115_s28 + $0x68] sm:$0xff]   ;;  %v1533_v50 = vld [vmem:[%s2115_s28 + $0x70] sm:$0xff]  }
  0xa8   : > { %527 = vmatprep.subr.bf16.mxu0 %v1481_v14  ;;  %600 = vmatprep.subr.bf16.mxu1 %v1506_v23  ;;  %v1532_v49 = vld [vmem:[%s2115_s28 + $0x28] sm:$0xff]   ;;  %v1534_v51 = vld [vmem:[%s2115_s28 + $0x30] sm:$0xff]   ;;  %v1535_v52 = vld [vmem:[%s2115_s28 + $0x78] sm:$0xff]  }
  0xa9   : > { %v1536_v53 = vld [vmem:[%s2115_s28 + $0x38] sm:$0xff]  }
  0xab   : > { %528 = vmatpush1.bf16.msra.mxu0 %v1483_v16  ;;  %601 = vmatpush1.bf16.msra.mxu1 %v1508_v26 }
  0xac   : > { %529 = vmatprep.subr.bf16.mxu0 %v1484_v18  ;;  %602 = vmatprep.subr.bf16.mxu1 %v1510_v27 }
  0xaf   : > { %530 = vmatpush1.bf16.msra.mxu0 %v1488_v20  ;;  %603 = vmatpush1.bf16.msra.mxu1 %v1512_v29 }
  0xb0   : > { %531 = vmatprep.subr.bf16.mxu0 %v1490_v22  ;;  %604 = vmatprep.subr.bf16.mxu1 %v1513_v30 }
  0xb3   : > { %532 = vmatpush1.bf16.msra.mxu0 %v1494_v24  ;;  %605 = vmatpush1.bf16.msra.mxu1 %v1515_v32 }
  0xb4   : > { %533 = vmatprep.subr.bf16.mxu0 %v1496_v25  ;;  %606 = vmatprep.subr.bf16.mxu1 %v1517_v33 }
  0xb7   : > { %534 = vmatpush1.bf16.msra.mxu0 %v1500_v28  ;;  %607 = vmatpush1.bf16.msra.mxu1 %v1519_v34 }
  0xb8   : > { %1292 = vmatprep.subr.bf16.mxu0 %v1521_v38  ;;  %1332 = vmatprep.subr.bf16.mxu1 %v1521_v38 }
  0xba   : > { %552 = vmatmul.mubr.bf16.vlgmr.msra.gmra.mrb[0].mxu0 %v1502_v31  ;;  %625 = vmatmul.mubr.bf16.vlgmr.msra.gmra.mrb[0].mxu1 %v1502_v31 }
  0xbb   : > { %561 = vmatprep.mubr.bf16.mxu0 %v1796_v3  ;;  %634 = vmatprep.mubr.bf16.mxu1 %v1796_v3 }
  0xbc   : > { %1293 = vmatpush3.bf16.msra.mxu0 %v1522_v39  ;;  %1340 = vmatpush3.bf16.msra.mxu1 %v1522_v39 }
  0xbd   : > { %1294 = vmatprep.subr.bf16.mxu0 %v1523_v40  ;;  %1333 = vmatprep.subr.bf16.mxu1 %v1523_v40 }
  0xc0   : > { %1295 = vmatpush3.bf16.msra.mxu0 %v1524_v41  ;;  %1341 = vmatpush3.bf16.msra.mxu1 %v1524_v41 }
  0xc1   : > { %1296 = vmatprep.subr.bf16.mxu0 %v1525_v42  ;;  %1334 = vmatprep.subr.bf16.mxu1 %v1525_v42 }
  0xc2   : > { %562 = vmatmul.mubr.bf16.gmra.mrb[4].mxu0 %v1509_v35  ;;  %635 = vmatmul.mubr.bf16.gmra.mrb[4].mxu1 %v1509_v35 }
  0xc3   : > { %571 = vmatprep.mubr.bf16.mxu0 %v1796_v3  ;;  %644 = vmatprep.mubr.bf16.mxu1 %v1796_v3 }
  0xc4   : > { %1297 = vmatpush3.bf16.msra.mxu0 %v1526_v43  ;;  %1342 = vmatpush3.bf16.msra.mxu1 %v1526_v43 }
  0xc5   : > { %1298 = vmatprep.subr.bf16.mxu0 %v1527_v44  ;;  %1335 = vmatprep.subr.bf16.mxu1 %v1527_v44 }
  0xc8   : > { %1299 = vmatpush3.bf16.msra.mxu0 %v1528_v45  ;;  %1343 = vmatpush3.bf16.msra.mxu1 %v1528_v45 }
  0xc9   : > { %1300 = vmatprep.subr.bf16.mxu0 %v1529_v46  ;;  %1336 = vmatprep.subr.bf16.mxu1 %v1529_v46 }
  0xca   : > { %572 = vmatmul.mubr.bf16.gmra.mrb[8].mxu0 %v1516_v36  ;;  %645 = vmatmul.mubr.bf16.gmra.mrb[8].mxu1 %v1516_v36 }
  0xcb   : > { %581 = vmatprep.mubr.bf16.mxu0 %v1796_v3  ;;  %654 = vmatprep.mubr.bf16.mxu1 %v1796_v3 }
  0xcc   : > { %1301 = vmatpush3.bf16.msra.mxu0 %v1530_v47  ;;  %1344 = vmatpush3.bf16.msra.mxu1 %v1530_v47 }
  0xcd   : > { %1302 = vmatprep.subr.bf16.mxu0 %v1531_v48  ;;  %1337 = vmatprep.subr.bf16.mxu1 %v1531_v48 }
  0xd0   : > { %1303 = vmatpush3.bf16.msra.mxu0 %v1532_v49  ;;  %1345 = vmatpush3.bf16.msra.mxu1 %v1532_v49 }
  0xd1   : > { %1304 = vmatprep.subr.bf16.mxu0 %v1533_v50  ;;  %1338 = vmatprep.subr.bf16.mxu1 %v1533_v50 }
  0xd2   : > { %582 = vmatmul.mubr.bf16.gmra.mrb[12].mxu0 %v1520_v37  ;;  %655 = vmatmul.mubr.bf16.gmra.mrb[12].mxu1 %v1520_v37 }
  0xd4   : > { %1305 = vmatpush3.bf16.msra.mxu0 %v1534_v51  ;;  %1346 = vmatpush3.bf16.msra.mxu1 %v1534_v51 }
  0xd5   : > { %1306 = vmatprep.subr.bf16.mxu0 %v1535_v52  ;;  %1339 = vmatprep.subr.bf16.mxu1 %v1535_v52 }
  0xd8   : > { %1307 = vmatpush3.bf16.msra.mxu0 %v1536_v53  ;;  %1347 = vmatpush3.bf16.msra.mxu1 %v1536_v53 }
 0x18d   : > { %v553_v54 = vpop.f32.mrb[0].mxu0  ;;  %v2180_v13 = vpop.f32.mrb[0].mxu1 }
 0x18e   : > { %v665_v55 = vmul.f32 %v553_v54, %v553_v54  ;;  %v555_v56 = vpop.f32.mrb[1].mxu0  ;;  %v697_v0 = vmul.f32 0.7978846, %v553_v54  ;;  %v2182_v17 = vpop.f32.mrb[1].mxu1  ;;  %v2188_v27 = vmul.f32 0.5, %v553_v54 }
 0x18f   : > { %v666_v57 = vmul.f32 %v555_v56, %v555_v56  ;;  %v557_v58 = vpop.f32.mrb[2].mxu0  ;;  %v698_v3 = vmul.f32 0.7978846, %v555_v56  ;;  %v2184_v21 = vpop.f32.mrb[2].mxu1  ;;  %v682_v31 = vmul.f32 0.5, %v555_v56 }
 0x190   : > { %v713_v59 = vmul.f32 0.044715, %v665_v55  ;;  %v667_v60 = vmul.f32 %v557_v58, %v557_v58  ;;  %v559_v61 = vpop.f32.mrb[3].mxu0  ;;  %v699_v7 = vmul.f32 0.7978846, %v557_v58  ;;  %v2186_v26 = vpop.f32.mrb[3].mxu1 }
 0x191   : > { %v714_v62 = vmul.f32 0.044715, %v666_v57  ;;  %v668_v63 = vmul.f32 %v559_v61, %v559_v61  ;;  %v700_v10 = vmul.f32 0.7978846, %v559_v61  ;;  %v683_v35 = vmul.f32 0.5, %v557_v58 }
 0x192   : > { %v729_v1 = vadd.f32 1.0, %v713_v59  ;;  %v715_v2 = vmul.f32 0.044715, %v667_v60  ;;  %v684_v36 = vmul.f32 0.5, %v559_v61 }
 0x193   : > { %v730_v4 = vadd.f32 1.0, %v714_v62  ;;  %v716_v5 = vmul.f32 0.044715, %v668_v63 }
 0x194   : > { %v745_v6 = vmul.f32 %v729_v1, %v697_v0  ;;  %v731_v8 = vadd.f32 1.0, %v715_v2 }
 0x195   : > { %v746_v9 = vmul.f32 %v730_v4, %v698_v3  ;;  %v732_v11 = vadd.f32 1.0, %v716_v5  ;;  %v563_v12 = vpop.f32.mrb[4].mxu0  ;;  %v2194_v44 = vpop.f32.mrb[4].mxu1 }
 0x196   : > { %1537 = vtanh.f32 %v745_v6  ;;  %v747_v14 = vmul.f32 %v731_v8, %v699_v7  ;;  %v669_v15 = vmul.f32 %v563_v12, %v563_v12  ;;  %v565_v16 = vpop.f32.mrb[5].mxu0  ;;  %v701_v28 = vmul.f32 0.7978846, %v563_v12  ;;  %v2202_v50 = vpop.f32.mrb[5].mxu1 }
 0x197   : > { %1539 = vtanh.f32 %v746_v9  ;;  %v748_v18 = vmul.f32 %v732_v11, %v700_v10  ;;  %v670_v19 = vmul.f32 %v565_v16, %v565_v16  ;;  %v567_v20 = vpop.f32.mrb[6].mxu0  ;;  %v702_v32 = vmul.f32 0.7978846, %v565_v16  ;;  %v2208_v55 = vpop.f32.mrb[6].mxu1 }
 0x198   : > { %1541 = vtanh.f32 %v747_v14  ;;  %v717_v22 = vmul.f32 0.044715, %v669_v15  ;;  %v569_v23 = vpop.f32.mrb[7].mxu0  ;;  %v671_v25 = vmul.f32 %v567_v20, %v567_v20  ;;  %v2190_v39 = vmul.f32 0.5, %v563_v12  ;;  %v2214_v1 = vpop.f32.mrb[7].mxu1 }
 0x199   : > { %1543 = vtanh.f32 %v748_v18  ;;  %v718_v24 = vmul.f32 0.044715, %v670_v19  ;;  %v672_v30 = vmul.f32 %v569_v23, %v569_v23  ;;  %v703_v41 = vmul.f32 0.7978846, %v567_v20 }
 0x19a   : > { %v733_v29 = vadd.f32 1.0, %v717_v22  ;;  %v719_v34 = vmul.f32 0.044715, %v671_v25  ;;  %v2196_v45 = vmul.f32 0.5, %v565_v16  ;;  %v704_v46 = vmul.f32 0.7978846, %v569_v23 }
 0x19b   : > { %v734_v33 = vadd.f32 1.0, %v718_v24  ;;  %v720_v38 = vmul.f32 0.044715, %v672_v30  ;;  %v2204_v51 = vmul.f32 0.5, %v567_v20  ;;  %v2218_v7 = vmul.f32 0.5, %v569_v23 }
 0x19c   : > { %v749_v37 = vmul.f32 %v733_v29, %v701_v28  ;;  %v735_v42 = vadd.f32 1.0, %v719_v34 }
 0x19d   : > { %v750_v40 = vmul.f32 %v734_v33, %v702_v32  ;;  %v2192_v43 = vpop.f32.mrb[8].mxu0  ;;  %v736_v47 = vadd.f32 1.0, %v720_v38  ;;  %v2223_v24 = vpop.f32.mrb[8].mxu1 }
 0x19e   : > { %v673_v48 = vmul.f32 %v2192_v43, %v2192_v43  ;;  %v2200_v49 = vpop.f32.mrb[9].mxu0  ;;  %1545 = vtanh.f32 %v749_v37  ;;  %v751_v52 = vmul.f32 %v735_v42, %v703_v41  ;;  %v705_v58 = vmul.f32 0.7978846, %v2192_v43  ;;  %v2228_v30 = vpop.f32.mrb[9].mxu1 }
 0x19f   : > { %v674_v53 = vmul.f32 %v2200_v49, %v2200_v49  ;;  %v577_v54 = vpop.f32.mrb[10].mxu0  ;;  %1547 = vtanh.f32 %v750_v40  ;;  %v752_v57 = vmul.f32 %v736_v47, %v704_v46  ;;  %v706_v62 = vmul.f32 0.7978846, %v2200_v49  ;;  %v2232_v38 = vpop.f32.mrb[10].mxu1 }
 0x1a0   : > { %v1538_v56 = vpop.eup %1537  ;;  %v721_v59 = vmul.f32 0.044715, %v673_v48  ;;  %v2211_v60 = vpop.f32.mrb[11].mxu0  ;;  %1549 = vtanh.f32 %v751_v52  ;;  %v675_v0 = vmul.f32 %v577_v54, %v577_v54  ;;  %v707_v4 = vmul.f32 0.7978846, %v577_v54 }
 0x1a1   : > { %v1540_v61 = vpop.eup %1539  ;;  %v722_v63 = vmul.f32 0.044715, %v674_v53  ;;  %1551 = vtanh.f32 %v752_v57  ;;  %v676_v5 = vmul.f32 %v2211_v60, %v2211_v60  ;;  %v708_v10 = vmul.f32 0.7978846, %v2211_v60  ;;  %v2240_v46 = vpop.f32.mrb[11].mxu1 }
 0x1a2   : > { %v1542_v2 = vpop.eup %1541  ;;  %v737_v3 = vadd.f32 1.0, %v721_v59  ;;  %v723_v9 = vmul.f32 0.044715, %v675_v0  ;;  %v777_v14 = vadd.f32 1.0, %v1538_v56  ;;  %v778_v15 = vadd.f32 1.0, %v1540_v61 }
 0x1a3   : > { %v1544_v6 = vpop.eup %1543  ;;  %v738_v8 = vadd.f32 1.0, %v722_v63  ;;  %v724_v12 = vmul.f32 0.044715, %v676_v5  ;;  %v779_v19 = vadd.f32 1.0, %v1542_v2  ;;  %v691_v57 = vmul.f32 0.5, %v577_v54 }
 0x1a4   : > { %v753_v11 = vmul.f32 %v737_v3, %v705_v58  ;;  %v739_v18 = vadd.f32 1.0, %v723_v9  ;;  %v780_v20 = vadd.f32 1.0, %v1544_v6  ;;  %v793_v23 = vmul.f32 %v777_v14, %v2188_v27 }
 0x1a5   : > { %v754_v16 = vmul.f32 %v738_v8, %v706_v62  ;;  %v2221_v22 = vpop.f32.mrb[12].mxu0  ;;  %v740_v25 = vadd.f32 1.0, %v724_v12  ;;  %v794_v28 = vmul.f32 %v778_v15, %v682_v31  ;;  %v795_v33 = vmul.f32 %v779_v19, %v683_v35  ;;  %v2257_v3 = vpop.f32.mrb[12].mxu1 }
 0x1a6   : > { %1553 = vtanh.f32 %v753_v11  ;;  %v2226_v29 = vpop.f32.mrb[13].mxu0  ;;  %v755_v32 = vmul.f32 %v739_v18, %v707_v4  ;;  %v796_v34 = vmul.f32 %v780_v20, %v684_v36  ;;  %v809_v41 = vmul.f32 %v793_v23, %v2180_v13  ;;  %v2259_v9 = vpop.f32.mrb[13].mxu1 }
 0x1a7   : > { %1555 = vtanh.f32 %v754_v16  ;;  %v2230_v37 = vpop.f32.mrb[14].mxu0  ;;  %v756_v40 = vmul.f32 %v740_v25, %v708_v10  ;;  %v810_v42 = vmul.f32 %v794_v28, %v2182_v17  ;;  %v677_v27 = vmul.f32 %v2221_v22, %v2221_v22  ;;  %v660_v14 = vpop.f32.mrb[14].mxu1 }
 0x1a8   : > { %v2238_v31 = vpop.f32.mrb[15].mxu0  ;;  %v1546_v47 = vpop.eup %1545  ;;  %v689_v35 = vmul.f32 0.5, %v2192_v43  ;;  %1557 = vtanh.f32 %v755_v32  ;;  %v811_v36 = vmul.f32 %v795_v33, %v2184_v21  ;;  %v812_v48 = vmul.f32 %v796_v34, %v2186_v26 }
 0x1a9   : > { %v1548_v52 = vpop.eup %1547  ;;  %v690_v13 = vmul.f32 0.5, %v2200_v49  ;;  %1559 = vtanh.f32 %v756_v40  ;;  %v725_v17 = vmul.f32 0.044715, %v677_v27  ;;  %v678_v53 = vmul.f32 %v2226_v29, %v2226_v29  ;;  %v662_v20 = vpop.f32.mrb[15].mxu1 }
 0x1aa   : > { %v1550_v56 = vpop.eup %1549  ;;  %v833_v58 = vpack.c.bf16 %v811_v36, %v809_v41  ;;  %v834_v59 = vpack.c.bf16 %v812_v48, %v810_v42  ;;  %v709_v61 = vmul.f32 0.7978846, %v2221_v22  ;;  %v710_v21 = vmul.f32 0.7978846, %v2226_v29 }
 0x1ab   : > { %v1552_v43 = vpop.eup %1551  ;;  %v741_v62 = vadd.f32 1.0, %v725_v17  ;;  %v726_v63 = vmul.f32 0.044715, %v678_v53  ;;  %v679_v26 = vmul.f32 %v2230_v37, %v2230_v37  ;;  %v692_v49 = vmul.f32 0.5, %v2211_v60 }
 0x1ac   : > { %v711_v0 = vmul.f32 0.7978846, %v2230_v37  ;;  %v680_v2 = vmul.f32 %v2238_v31, %v2238_v31  ;;  %v712_v54 = vmul.f32 0.7978846, %v2238_v31  ;;  %1001 = vmatprep.mubr.bf16.mxu0 %v834_v59  ;;  %v781_v8 = vadd.f32 1.0, %v1546_v47 }
 0x1ad   : > { %v757_v4 = vmul.f32 %v741_v62, %v709_v61  ;;  %v742_v5 = vadd.f32 1.0, %v726_v63  ;;  %v727_v6 = vmul.f32 0.044715, %v679_v26  ;;  %1002 = vmatmul.mubr.bf16.vlgmr.msra.gmra.mrb[16].mxu0 %v833_v58  ;;  %v782_v11 = vadd.f32 1.0, %v1548_v52 }
 0x1ae   : > { %v728_v10 = vmul.f32 0.044715, %v680_v2  ;;  %v783_v60 = vadd.f32 1.0, %v1550_v56  ;;  %v784_v12 = vadd.f32 1.0, %v1552_v43  ;;  %v797_v19 = vmul.f32 %v781_v8, %v2190_v39 }
 0x1af   : > { %1561 = vtanh.f32 %v757_v4  ;;  %v758_v16 = vmul.f32 %v742_v5, %v710_v21  ;;  %v743_v18 = vadd.f32 1.0, %v727_v6  ;;  %v798_v28 = vmul.f32 %v782_v11, %v2196_v45 }
 0x1b0   : > { %v1554_v15 = vpop.eup %1553  ;;  %v744_v23 = vadd.f32 1.0, %v728_v10  ;;  %v799_v32 = vmul.f32 %v783_v60, %v2204_v51  ;;  %v800_v33 = vmul.f32 %v784_v12, %v2218_v7  ;;  %v813_v40 = vmul.f32 %v797_v19, %v2194_v44  ;;  %v825_v60 = vld [vmem:[#allocation2] sm:$0xff] }
 0x1b1   : > { %v1556_v25 = vpop.eup %1555  ;;  %1563 = vtanh.f32 %v758_v16  ;;  %v759_v34 = vmul.f32 %v743_v18, %v711_v0  ;;  %v785_v41 = vadd.f32 1.0, %v1554_v15  ;;  %v814_v47 = vmul.f32 %v798_v28, %v2202_v50  ;;  %v826_v15 = vld [vmem:[#allocation2 + $0x8] sm:$0xff]  ;;  %v828_v28 = vld [vmem:[#allocation2 + $0x18] sm:$0xff] }
 0x1b2   : > { %v1558_v42 = vpop.eup %1557  ;;  %v760_v27 = vmul.f32 %v744_v23, %v712_v54  ;;  %v815_v39 = vmul.f32 %v799_v32, %v2208_v55  ;;  %v816_v36 = vmul.f32 %v800_v33, %v2214_v1  ;;  %v786_v52 = vadd.f32 1.0, %v1556_v25  ;;  %v827_v25 = vld [vmem:[#allocation2 + $0x10] sm:$0xff] }
 0x1b3   : > { %v1560_v48 = vpop.eup %1559  ;;  %1565 = vtanh.f32 %v759_v34  ;;  %v801_v45 = vmul.f32 %v785_v41, %v689_v35  ;;  %v787_v51 = vadd.f32 1.0, %v1558_v42  ;;  %v693_v43 = vmul.f32 0.5, %v2221_v22  ;;  %v829_v42 = vld [vmem:[#allocation2 + $0x20] sm:$0xff] }
 0x1b4   : > { %1567 = vtanh.f32 %v760_v27  ;;  %v835_v7 = vpack.c.bf16 %v815_v39, %v813_v40  ;;  %v836_v17 = vpack.c.bf16 %v816_v36, %v814_v47  ;;  %v788_v53 = vadd.f32 1.0, %v1560_v48  ;;  %v830_v36 = vld [vmem:[#allocation2 + $0x28] sm:$0xff] }
 0x1b5   : > { %v817_v44 = vmul.f32 %v801_v45, %v2223_v24  ;;  %v802_v56 = vmul.f32 %v786_v52, %v690_v13  ;;  %v803_v58 = vmul.f32 %v787_v51, %v691_v57  ;;  %v694_v24 = vmul.f32 0.5, %v2226_v29 }
 0x1b6   : > { %v804_v59 = vmul.f32 %v788_v53, %v692_v49  ;;  %1009 = vmatprep.mubr.bf16.mxu0 %v836_v17  ;;  %v696_v2 = vmul.f32 0.5, %v2238_v31  ;;  %v831_v17 = vld [vmem:[#allocation2 + $0x30] sm:$0xff] }
 0x1b7   : > { %v818_v50 = vmul.f32 %v802_v56, %v2228_v30  ;;  %v819_v55 = vmul.f32 %v803_v58, %v2232_v38  ;;  %1010 = vmatmul.mubr.bf16.gmra.mrb[20].mxu0 %v835_v7  ;;  %v695_v38 = vmul.f32 0.5, %v2230_v37  ;;  %v832_v58 = vld [vmem:[#allocation2 + $0x38] sm:$0xff] }
 0x1b8   : > { %v820_v1 = vmul.f32 %v804_v59, %v2240_v46 }
 0x1b9   : > { %v1562_v35 = vpop.eup %1561  ;;  %v837_v61 = vpack.c.bf16 %v819_v55, %v817_v44 }
 0x1ba   : > { %v838_v62 = vpack.c.bf16 %v820_v1, %v818_v50  ;;  %v789_v21 = vadd.f32 1.0, %v1562_v35 }
 0x1bb   : > { %v1564_v63 = vpop.eup %1563 }
 0x1bc   : > { %v805_v13 = vmul.f32 %v789_v21, %v693_v43  ;;  %v790_v57 = vadd.f32 1.0, %v1564_v63  ;;  %1017 = vmatprep.mubr.bf16.mxu1 %v838_v62 }
 0x1bd   : > { %v1566_v26 = vpop.eup %1565  ;;  %1018 = vmatmul.mubr.bf16.vlgmr.msra.gmra.mrb[16].mxu1 %v837_v61 }
 0x1be   : > { %v1568_v30 = vpop.eup %1567  ;;  %v821_v49 = vmul.f32 %v805_v13, %v2257_v3  ;;  %v806_v46 = vmul.f32 %v790_v57, %v694_v24  ;;  %v791_v0 = vadd.f32 1.0, %v1566_v26 }
 0x1bf   : > { %v792_v22 = vadd.f32 1.0, %v1568_v30 }
 0x1c0   : > { %v822_v54 = vmul.f32 %v806_v46, %v2259_v9  ;;  %v807_v4 = vmul.f32 %v791_v0, %v695_v38 }
 0x1c1   : > { %v808_v5 = vmul.f32 %v792_v22, %v696_v2 }
 0x1c2   : > { %v823_v29 = vmul.f32 %v807_v4, %v660_v14 }
 0x1c3   : > { %v824_v6 = vmul.f32 %v808_v5, %v662_v20 }
 0x1c4   : > { %v839_v8 = vpack.c.bf16 %v823_v29, %v821_v49 }
 0x1c5   : > { %v840_v10 = vpack.c.bf16 %v824_v6, %v822_v54 }
 0x1c7   : > { %1025 = vmatprep.mubr.bf16.mxu1 %v840_v10 }
 0x1c8   : > { %1026 = vmatmul.mubr.bf16.gmra.mrb[20].mxu1 %v839_v8 }
 0x280   : > { %v1308_v11 = vpop.f32.mrb[16].mxu0 }
 0x281   : > { %v1309_v37 = vpop.f32.mrb[17].mxu0 }
 0x282   : > { %v1310_v12 = vadd.f32 %v1309_v37, %v1308_v11  ;;  %v1311_v3 = vpop.f32.mrb[18].mxu0 }
 0x283   : > { %v1312_v16 = vpop.f32.mrb[19].mxu0 }
 0x284   : > { %v1034_v18 = vadd.f32 %v1310_v12, %v825_v60  ;;  %v1313_v31 = vadd.f32 %v1312_v16, %v1311_v3 }
 0x286   : > { %1042 = vst [vmem:[#allocation2] sm:$0xff] %v1034_v18  ;;  %v1035_v19 = vadd.f32 %v1313_v31, %v826_v15 }
 0x288   : > { %1043 = vst [vmem:[#allocation2 + $0x8] sm:$0xff] %v1035_v19 }
 0x28a   : > { %v1314_v9 = vpop.f32.mrb[20].mxu0 }
 0x28b   : > { %v1315_v14 = vpop.f32.mrb[21].mxu0 }
 0x28c   : > { %v1316_v20 = vadd.f32 %v1315_v14, %v1314_v9  ;;  %v1317_v23 = vpop.f32.mrb[22].mxu0 }
 0x28d   : > { %v1318_v32 = vpop.f32.mrb[23].mxu0  ;;  %v1054_v35 = vld [vmem:[#allocation2] sm:$0xff] (!%p1282_p12) }
 0x28e   : > { %v1036_v33 = vadd.f32 %v1316_v20, %v827_v25  ;;  %v1319_v34 = vadd.f32 %v1318_v32, %v1317_v23  ;;  %1062 = vst [vmem:[%s2117_s24] sm:$0xff] (!%p1282_p12), %v1054_v35 }
 0x28f   : > { %v1055_v61 = vld [vmem:[#allocation2 + $0x8] sm:$0xff] (!%p1282_p12) }
 0x290   : > { %1044 = vst [vmem:[#allocation2 + $0x10] sm:$0xff] %v1036_v33  ;;  %v1037_v40 = vadd.f32 %v1319_v34, %v828_v28  ;;  %v1320_v41 = vpop.f32.mrb[16].mxu1  ;;  %1063 = vst [vmem:[%s2117_s24 + $0x8] sm:$0xff] (!%p1282_p12), %v1055_v61 }
 0x291   : > { %v1321_v27 = vpop.f32.mrb[17].mxu1 }
 0x292   : > { %1045 = vst [vmem:[#allocation2 + $0x18] sm:$0xff] %v1037_v40  ;;  %v1322_v47 = vadd.f32 %v1321_v27, %v1320_v41  ;;  %v1323_v39 = vpop.f32.mrb[18].mxu1 }
 0x293   : > { %v1324_v48 = vpop.f32.mrb[19].mxu1 }
 0x294   : > { %v1038_v45 = vadd.f32 %v1322_v47, %v829_v42  ;;  %v1325_v52 = vadd.f32 %v1324_v48, %v1323_v39 }
 0x296   : > { %1046 = vst [vmem:[#allocation2 + $0x20] sm:$0xff] %v1038_v45  ;;  %v1039_v51 = vadd.f32 %v1325_v52, %v830_v36 }
 0x297   : > { %v1056_v43 = vld [vmem:[#allocation2 + $0x10] sm:$0xff] (!%p1282_p12) }
 0x298   : > { %1047 = vst [vmem:[#allocation2 + $0x28] sm:$0xff] %v1039_v51  ;;  %1064 = vst [vmem:[%s2117_s24 + $0x10] sm:$0xff] (!%p1282_p12), %v1056_v43 }
 0x299   : > { %v1057_v62 = vld [vmem:[#allocation2 + $0x18] sm:$0xff] (!%p1282_p12) }
 0x29a   : > { %1065 = vst [vmem:[%s2117_s24 + $0x18] sm:$0xff] (!%p1282_p12), %v1057_v62 }
 0x29b   : > { %v1326_v7 = vpop.f32.mrb[20].mxu1 }
 0x29c   : > { %v1327_v53 = vpop.f32.mrb[21].mxu1 }
 0x29d   : > { %v1328_v44 = vadd.f32 %v1327_v53, %v1326_v7  ;;  %v1329_v56 = vpop.f32.mrb[22].mxu1  ;;  %1053 = sbr.rel (%p1282_p12) target bundleno = 684 (0x2ac), region = 52  ;;  %v1058_v21 = vld [vmem:[#allocation2 + $0x20] sm:$0xff] (!%p1282_p12) }
 0x29e   : > { %v1330_v59 = vpop.f32.mrb[23].mxu1  ;;  %1066 = vst [vmem:[%s2117_s24 + $0x20] sm:$0xff] (!%p1282_p12), %v1058_v21 }
 0x29f   : > { %v1040_v50 = vadd.f32 %v1328_v44, %v831_v17  ;;  %v1331_v55 = vadd.f32 %v1330_v59, %v1329_v56  ;;  %v1059_v63 = vld [vmem:[#allocation2 + $0x28] sm:$0xff] (!%p1282_p12) }
 0x2a0   : > { %1067 = vst [vmem:[%s2117_s24 + $0x28] sm:$0xff] (!%p1282_p12), %v1059_v63 }
 0x2a1   : > { %1048 = vst [vmem:[#allocation2 + $0x30] sm:$0xff] %v1040_v50  ;;  %v1041_v1 = vadd.f32 %v1331_v55, %v832_v58 }
 0x2a3   : > { %1049 = vst [vmem:[#allocation2 + $0x38] sm:$0xff] %v1041_v1 }
 0x2a8   : > { %v1060_v24 = vld [vmem:[#allocation2 + $0x30] sm:$0xff] }
 0x2a9   : > { %1068 = vst [vmem:[%s2117_s24 + $0x30] sm:$0xff] %v1060_v24 }
 0x2aa   : > { %v1061_v13 = vld [vmem:[#allocation2 + $0x38] sm:$0xff] }
 0x2ab   : > { %1069 = vst [vmem:[%s2117_s24 + $0x38] sm:$0xff] %v1061_v13 }
 0x2ac PF: > { %s1291_s18 = sshll.u32 %s1773_s19, 10  ;;  %s2404_s12 = sld [smem:[#allocation21_spill]] }
 0x2ad   : > { %s1084_s21 = sshll.u32 %s2117_s24, 4  ;;  %s1071_s5 = scalar_lea.sflag [#allocation5], %s2096_s0  ;;  %s2295_s21 = int_to_ptr.vmem [resolvable:$true] %s1084_s21 }
 0x2ae   : > { %s1659_s26 = scalar_lea.vmem %s2295_s21, 1024  ;;  %p2406_p11 = scmp.ne.s32.totalorder %s2392_s4, 0 }
 0x2af   : > { %p1660_p13 = scmp.ne.s32.totalorder %s2295_s21, %s1659_s26  ;;  %s1797_s8 = smov [#allocation9]  }
 0x2b0   : > { %s1663_s25 = sshll.u32 %s1797_s8, 4  ;;  %s1664_s25 = int_to_ptr.vmem [resolvable:$false] %s1663_s25 }
 0x2b1   : > { %p1661_p6 = pnand %p1660_p13, %p2406_p11  ;;  %s1665_s19 = scalar_lea.vmem %s1664_s25, 2048 }
 0x2b2   : > { %s2405_s3 = smov %s2404_s12  ;;  %s2292_s30 = scalar_lea.hbm %s2404_s12, %s1291_s18 }
 0x2b3   : > { %p1662_p10 = pneg %p1661_p6  ;;  %p1666_p5 = scmp.lt.s32.totalorder %s2295_s21, %s1664_s25 }
 0x2b4   : > { %p1667_p1 = scmp.lt.s32.totalorder %s1665_s19, %s1659_s26 }
 0x2b6   : > { %p1668_p0 = por %p1667_p1, %p1666_p5 }
 0x2b8   : > { %p1669_p9 = pnand %p1668_p0, %p1662_p10 }
 0x2ba   : > { %1672 = shalt.err (!%p1669_p9)
}
 0x2bb   : > { %s1673_s10 = scalar_lea.hbm %s2292_s30, 1024  ;;  %s1677_s29 = scalar_lea.hbm %s2405_s3, 2048 }
 0x2bc   : > { %p1674_p2 = scmp.ne.s32.totalorder %s2292_s30, %s1673_s10  ;;  %p1678_p7 = scmp.lt.u32.totalorder %s2292_s30, %s2405_s3 }
 0x2bd   : > { %p1679_p8 = scmp.lt.u32.totalorder %s1677_s29, %s1673_s10  ;;  %p1681_p13 = scmp.lt.u32.totalorder %s1673_s10, %s2292_s30 }
 0x2be   : > { %p1675_p3 = pnand %p1674_p2, %p2406_p11 }
 0x2bf   : > { %p1680_p12 = por %p1679_p8, %p1678_p7 }
 0x2c0   : > { %p1676_p4 = pneg %p1675_p3 }
 0x2c1   : > { %p1682_p6 = por %p1681_p13, %p1680_p12 }
 0x2c3   : > { %p1683_p10 = pnand %p1682_p6, %p1676_p4 }
 0x2c5   : > { %1686 = shalt.err (!%p1683_p10)
}
 0x2c6   : > { %s1798_s17 = smov 128   ;;  %s1799_s28 = smov 8  }
 0x2c7   : > { %1354 = dma.vmem_to_hbm [thread:$0]  (%p2406_p11), %s2295_s21, 1024, %s2292_s30, %s1071_s5, %s1798_s17, %s1798_s17, %s1799_s28  }
 0x2c8 PF: > { %p1371_p5 = scmp.ge.s32.totalorder %s1785_s22, 2  ;;  %s1099_s24 = sand.u32 1, %s1757_s15  }
 0x2c9   : > { %p2407_p1 = scmp.ne.s32.totalorder %s2394_s23, 0  ;;  %s1100_s18 = scalar_lea.sflag [#allocation5], %s1099_s24 }
 0x2cb   : > { %p1367_p0 = pnand %p1371_p5, %p2407_p1 }
 0x2cd   : > { %1740 = dma.done.wait (!%p1367_p0), %s1100_s18, 1024  }
 0x2ce   : > { %1742 = vsyncadd (!%p1367_p0), %s1100_s18, 4294966272  ;;  %s22_s22 = sadd.s32 1, %s1785_s22   ;;  %s2408_s27 = sld [smem:[#allocation16_spill]] }
 0x2cf   : > { %p19_p9 = scmp.ge.s32.totalorder %s22_s22, 6   ;;  %s2409_s4 = sld [smem:[#allocation13_spill]] }
 0x2d0   : > { %s2410_s17 = sld [smem:[#allocation18_spill]]  ;;  %s2411_s19 = sld [smem:[#allocation14_spill]] }
 0x2d1   : > { %s2412_s0 = sld [smem:[#allocation15_spill]]  ;;  %s2413_s21 = sld [smem:[#allocation17_spill]] }
 0x2d2   : > { %s2414_s12 = smov %s1749_s13  ;;  %s2415_s13 = smov %s1753_s14 }
 0x2d3   : > { %s2417_s15 = smov %s1761_s16  ;;  %s2419_s18 = smov %s1777_s20 }
 0x2d4   : > { %s2416_s14 = smov %s2408_s27  ;;  %21 = sbr.rel (!%p19_p9) target bundleno = 15 (0xf), region = 109 }
 0x2d5   : > { %s2418_s16 = smov %s2409_s4 }
 0x2d7   : > { %s2420_s20 = smov %s2412_s0 }
 0x2db   :  { %1105 = vsyncpa [#allocation4], 1 }
 0x2dc   :  { %1107 = vsyncpa [#allocation4 + $0x1], 1 }
 0x2dd   :  { %1108 = vsyncpa [#allocation7], 1 }
 0x2de   :  { %1110 = vsyncpa [#allocation7 + $0x1], 1 }
 0x2df   :  { %1111 = vsyncpa [#allocation5], 1 }
 0x2e0   :  { %1113 = vsyncpa [#allocation5 + $0x1], 1 }

</bundles_post_ra>
